<compile_context>
chip_gen: v6e
topology: v6e:2x2x1
jax: 0.10.0
libtpu: 0.0.40
codegen_flags: <defaults>
</compile_context>

<pallas_src>
import functools

import jax
import jax.numpy as jnp
from jax.experimental import pallas as pl
from jax.experimental.pallas import tpu as pltpu


# ---------------------------------------------------------------------------
# Kernel
# ---------------------------------------------------------------------------
def _decoder_kernel(x_ref, w1t_ref, b1_ref, w2t_ref, b2_ref, o_ref, *,
                    tanh_dtype):
    # Layer 1: h = relu(x @ W1^T + b1)            -> [tile_b, node_dim]
    h = jnp.dot(x_ref[...], w1t_ref[...], preferred_element_type=jnp.float32)
    h = jnp.maximum(h + b1_ref[...], 0.0)
    # Layer 2: y = tanh(h @ W2^T + b2)            -> [tile_b, feat_size]
    y = jnp.dot(h.astype(w2t_ref.dtype), w2t_ref[...],
                preferred_element_type=jnp.float32)
    y = (y + b2_ref[...]).astype(tanh_dtype)
    o_ref[...] = jnp.tanh(y).astype(o_ref.dtype)


# ---------------------------------------------------------------------------
# Device heuristics (compile-safe defaults if detection fails)
# ---------------------------------------------------------------------------
def _device_kind():
    try:
        return jax.devices()[0].device_kind.lower()
    except Exception:
        return ""


def _num_tensorcores():
    kind = _device_kind()
    return 2 if ("v7" in kind or "7x" in kind) else 1


def _tanh_dtype(compute_dtype):
    kind = _device_kind()
    if compute_dtype == jnp.bfloat16 and any(g in kind for g in ("v6", "v7", "7x")):
        return jnp.bfloat16      # bf16 EUP/VPU available (v6e / v7x)
    return jnp.float32           # v5e (no bf16 EUP) or unknown device


def _round_up(x, m):
    return ((x + m - 1) // m) * m


# ---------------------------------------------------------------------------
# Wrapper
# ---------------------------------------------------------------------------
def decoder_forward(x, w1, b1, w2, b2, *, tile_b=None,
                    compute_dtype=jnp.bfloat16):
    """x: [B, node_dim+class_dim] -> [B, feat_size].

    Parameters use the PyTorch convention:
      w1: [node_dim,  node_dim+class_dim]   b1: [node_dim]
      w2: [feat_size, node_dim]             b2: [feat_size]
    """
    B, in_dim = x.shape
    node_dim = w1.shape[0]
    feat_size = w2.shape[0]
    out_dtype = x.dtype
    out_itemsize = jnp.dtype(out_dtype).itemsize

    tanh_dtype = _tanh_dtype(compute_dtype)

    if tile_b is None:
        # One large tile per TensorCore (cap 2048): with ~7 KFLOP per row the
        # kernel is step-overhead / HBM-bound, so amortize the ~0.35us fixed
        # per-step cost over as much data as possible.  Only v7x (2 TCs)
        # benefits from splitting the batch into >=2 "parallel" steps.
        num_tc = _num_tensorcores()
        tile_b = min(_round_up(max(pl.cdiv(B, num_tc), 1), 128), 2048)

    n_tiles = pl.cdiv(B, tile_b)
    B_pad = n_tiles * tile_b

    # Cast activations to the compute dtype at the boundary (halves the
    # dominant input DMA bytes) and pad ragged batches up to the tile.
    x = x.astype(compute_dtype)
    if B_pad != B:
        x = jnp.pad(x, ((0, B_pad - B), (0, 0)))

    # Tiny weight transposes in the wrapper (KiB-scale, negligible) so both
    # matmuls stream the activations as the LHS with no in-kernel transposes.
    w1t = w1.T.astype(compute_dtype)                       # [in_dim, node_dim]
    w2t = w2.T.astype(compute_dtype)                       # [node_dim, feat_size]
    b1r = b1.reshape(1, node_dim).astype(jnp.float32)      # [1, node_dim]
    b2r = b2.reshape(1, feat_size).astype(jnp.float32)     # [1, feat_size]

    bytes_per = lambda a: a.size * a.dtype.itemsize
    cost = pl.CostEstimate(
        flops=2 * B_pad * (in_dim * node_dim + node_dim * feat_size),
        transcendentals=B_pad * feat_size,
        bytes_accessed=(bytes_per(x)
                        + B_pad * feat_size * out_itemsize
                        + bytes_per(w1t) + bytes_per(b1r)
                        + bytes_per(w2t) + bytes_per(b2r)),
    )

    kernel = functools.partial(_decoder_kernel, tanh_dtype=tanh_dtype)

    out = pl.pallas_call(
        kernel,
        out_shape=jax.ShapeDtypeStruct((B_pad, feat_size), out_dtype),
        grid_spec=pltpu.PrefetchScalarGridSpec(
            num_scalar_prefetch=0,
            grid=(n_tiles,),
            in_specs=[
                pl.BlockSpec((tile_b, in_dim), lambda i: (i, 0)),        # x
                # Constant block index -> params stay VMEM-resident across
                # the whole grid (no per-step re-fetch).
                pl.BlockSpec((in_dim, node_dim), lambda i: (0, 0)),      # W1^T
                pl.BlockSpec((1, node_dim), lambda i: (0, 0)),           # b1
                pl.BlockSpec((node_dim, feat_size), lambda i: (0, 0)),   # W2^T
                pl.BlockSpec((1, feat_size), lambda i: (0, 0)),          # b2
            ],
            out_specs=pl.BlockSpec((tile_b, feat_size), lambda i: (i, 0)),
        ),
        compiler_params=pltpu.CompilerParams(
            dimension_semantics=("parallel",)),
        cost_estimate=cost,
    )(x, w1t, b1r, w2t, b2r)

    # Drop padded rows (no-op when B is already tile-aligned).
    return out[:B] if B_pad != B else out


# ---------------------------------------------------------------------------
# PyTorch-style init (weights in [out, in] layout, 1-D biases)
# ---------------------------------------------------------------------------
def init_params(key, node_dim, class_dim, feat_size,
                weight_dtype=jnp.bfloat16, bias_dtype=jnp.float32):
    in_dim = node_dim + class_dim
    k1, k2, k3, k4 = jax.random.split(key, 4)
    bound1 = 1.0 / jnp.sqrt(in_dim)
    bound2 = 1.0 / jnp.sqrt(node_dim)
    w1 = jax.random.uniform(k1, (node_dim, in_dim), jnp.float32, -bound1, bound1)
    b1 = jax.random.uniform(k2, (node_dim,), jnp.float32, -bound1, bound1)
    w2 = jax.random.uniform(k3, (feat_size, node_dim), jnp.float32, -bound2, bound2)
    b2 = jax.random.uniform(k4, (feat_size,), jnp.float32, -bound2, bound2)
    return (w1.astype(weight_dtype), b1.astype(bias_dtype),
            w2.astype(weight_dtype), b2.astype(bias_dtype))


if __name__ == "__main__":
    # Shapes consistent with the module's forward.
    node_dim, class_dim, feat_size = 32, 16, 64
    batch = 256

    key = jax.random.PRNGKey(0)
    kx, kp = jax.random.split(key)
    x = jax.random.normal(kx, (batch, node_dim + class_dim), jnp.float32)
    w1, b1, w2, b2 = init_params(kp, node_dim, class_dim, feat_size)

    out = decoder_forward(x, w1, b1, w2, b2)
    out = jax.block_until_ready(out)
    assert out.shape == (batch, feat_size)

    # Strict reference mirroring the kernel's bf16-weight / f32-accum path
    # (and the same tanh precision gate).
    tanh_dt = _tanh_dtype(jnp.bfloat16)
    xb = x.astype(jnp.bfloat16)
    h_ref = jnp.maximum(
        jnp.dot(xb, w1.T, preferred_element_type=jnp.float32) + b1[None, :], 0.0)
    y_ref = jnp.dot(h_ref.astype(jnp.bfloat16), w2.T,
                    preferred_element_type=jnp.float32) + b2[None, :]
    ref_matched = jnp.tanh(y_ref.astype(tanh_dt)).astype(jnp.float32)
    matched_tol = 2e-2 if tanh_dt == jnp.bfloat16 else 2e-3
    assert jnp.allclose(out, ref_matched, atol=matched_tol, rtol=matched_tol)

    # Loose reference against pure-f32 PyTorch semantics (bf16 weights /
    # activations / tanh change numerics slightly, hence wider tolerance).
    w1f, w2f = w1.astype(jnp.float32), w2.astype(jnp.float32)
    ref_f32 = jnp.tanh(jnp.maximum(x @ w1f.T + b1[None, :], 0.0) @ w2f.T
                       + b2[None, :])
    assert jnp.allclose(out, ref_f32, atol=5e-2, rtol=5e-2)

    print("KERNEL_OK")
</pallas_src>

<mosaic_0001>
module attributes {stable_mosaic.version = 11 : i64} {
  func.func @_decoder_kernel(%arg0: i32, %arg1: memref<256x48xbf16, #tpu.memory_space<vmem>>, %arg2: memref<48x32xbf16, #tpu.memory_space<vmem>>, %arg3: memref<1x32xf32, #tpu.memory_space<vmem>>, %arg4: memref<32x64xbf16, #tpu.memory_space<vmem>>, %arg5: memref<1x64xf32, #tpu.memory_space<vmem>>, %arg6: memref<256x64xf32, #tpu.memory_space<vmem>>) attributes {dimension_semantics = [#tpu.dimension_semantics<parallel>], iteration_bounds = array<i64: 1>, scalar_prefetch = 0 : i64, scratch_operands = 0 : i64, tpu.core_type = #tpu.core_type<tc>, window_params = [{transform_indices = @transform_0, window_bounds = array<i64: 256, 48>}, {pipeline_mode = #tpu.pipeline_mode<synchronous>, transform_indices = @transform_1, window_bounds = array<i64: 48, 32>}, {pipeline_mode = #tpu.pipeline_mode<synchronous>, transform_indices = @transform_2, window_bounds = array<i64: 1, 32>}, {pipeline_mode = #tpu.pipeline_mode<synchronous>, transform_indices = @transform_3, window_bounds = array<i64: 32, 64>}, {pipeline_mode = #tpu.pipeline_mode<synchronous>, transform_indices = @transform_4, window_bounds = array<i64: 1, 64>}, {transform_indices = @transform_5, window_bounds = array<i64: 256, 64>}]} {
    %c0 = arith.constant 0 : index
    %c0_0 = arith.constant 0 : index
    %0 = vector.load %arg1[%c0, %c0_0] : memref<256x48xbf16, #tpu.memory_space<vmem>>, vector<256x48xbf16>
    %c0_1 = arith.constant 0 : index
    %c0_2 = arith.constant 0 : index
    %1 = vector.load %arg2[%c0_1, %c0_2] : memref<48x32xbf16, #tpu.memory_space<vmem>>, vector<48x32xbf16>
    %cst = arith.constant dense<0.000000e+00> : vector<256x32xf32>
    %2 = tpu.matmul %0, %1, %cst {dimension_numbers = #tpu.dot_dimension_numbers<[1], [0], [0], [1], [0, 0, 1, 1], [], []>} : vector<256x48xbf16>, vector<48x32xbf16>, vector<256x32xf32> -> vector<256x32xf32>
    %c0_3 = arith.constant 0 : index
    %c0_4 = arith.constant 0 : index
    %3 = vector.load %arg3[%c0_3, %c0_4] : memref<1x32xf32, #tpu.memory_space<vmem>>, vector<1x32xf32>
    %4 = vector.broadcast %3 : vector<1x32xf32> to vector<256x32xf32>
    %5 = arith.addf %2, %4 : vector<256x32xf32>
    %cst_5 = arith.constant 0.000000e+00 : f32
    %6 = vector.broadcast %cst_5 : f32 to vector<256x32xf32>
    %7 = arith.maximumf %5, %6 : vector<256x32xf32>
    %8 = arith.truncf %7 : vector<256x32xf32> to vector<256x32xbf16>
    %c0_6 = arith.constant 0 : index
    %c0_7 = arith.constant 0 : index
    %9 = vector.load %arg4[%c0_6, %c0_7] : memref<32x64xbf16, #tpu.memory_space<vmem>>, vector<32x64xbf16>
    %cst_8 = arith.constant dense<0.000000e+00> : vector<256x64xf32>
    %10 = tpu.matmul %8, %9, %cst_8 {dimension_numbers = #tpu.dot_dimension_numbers<[1], [0], [0], [1], [0, 0, 1, 1], [], []>} : vector<256x32xbf16>, vector<32x64xbf16>, vector<256x64xf32> -> vector<256x64xf32>
    %c0_9 = arith.constant 0 : index
    %c0_10 = arith.constant 0 : index
    %11 = vector.load %arg5[%c0_9, %c0_10] : memref<1x64xf32, #tpu.memory_space<vmem>>, vector<1x64xf32>
    %12 = vector.broadcast %11 : vector<1x64xf32> to vector<256x64xf32>
    %13 = arith.addf %10, %12 : vector<256x64xf32>
    %14 = math.tanh %13 : vector<256x64xf32>
    %c0_11 = arith.constant 0 : index
    %c0_12 = arith.constant 0 : index
    %15 = vector.load %arg6[%c0_11, %c0_12] : memref<256x64xf32, #tpu.memory_space<vmem>>, vector<256x64xf32>
    tpu.vector_store %arg6[%c0_11, %c0_12], %14 {strides = array<i32>} : memref<256x64xf32, #tpu.memory_space<vmem>>, vector<256x64xf32>,
    return
  }
  func.func @transform_0(%arg0: i32) -> (i32, i32) {
    %c0_i32 = arith.constant 0 : i32
    %c0_i32_0 = arith.constant 0 : i32
    return %arg0, %c0_i32 : i32, i32
  }
  func.func @transform_1(%arg0: i32) -> (i32, i32) {
    %c0_i32 = arith.constant 0 : i32
    %c0_i32_0 = arith.constant 0 : i32
    %c0_i32_1 = arith.constant 0 : i32
    return %c0_i32, %c0_i32_0 : i32, i32
  }
  func.func @transform_2(%arg0: i32) -> (i32, i32) {
    %c0_i32 = arith.constant 0 : i32
    %c0_i32_0 = arith.constant 0 : i32
    %c0_i32_1 = arith.constant 0 : i32
    return %c0_i32, %c0_i32_0 : i32, i32
  }
  func.func @transform_3(%arg0: i32) -> (i32, i32) {
    %c0_i32 = arith.constant 0 : i32
    %c0_i32_0 = arith.constant 0 : i32
    %c0_i32_1 = arith.constant 0 : i32
    return %c0_i32, %c0_i32_0 : i32, i32
  }
  func.func @transform_4(%arg0: i32) -> (i32, i32) {
    %c0_i32 = arith.constant 0 : i32
    %c0_i32_0 = arith.constant 0 : i32
    %c0_i32_1 = arith.constant 0 : i32
    return %c0_i32, %c0_i32_0 : i32, i32
  }
  func.func @transform_5(%arg0: i32) -> (i32, i32) {
    %c0_i32 = arith.constant 0 : i32
    %c0_i32_0 = arith.constant 0 : i32
    return %arg0, %c0_i32 : i32, i32
  }
}

</mosaic_0001>

<bundles_post_ra>
// kernel: tpu_custom_call.1
= control target key start
LH: loop header
LB: loop body
LE: loop exit
PB: predicated region body
PF: predicated region fallthrough
CT: control target
= control target key end

     0   :  { %vm164_vm0 = vcmask 392192   ;;  %vm445_vm1 = vcmask 261120   ;;  %vm687_vm2 = vcmask 523264   ;;  %s1302_s1 = inlined_call_operand.vmem [shape: bf16[48,32], index: 1, kind: input, shape index: {}]   ;;  %s1303_s0 = inlined_call_operand.vmem [shape: bf16[256,48], index: 0, kind: input, shape index: {}]   ;;  %s1304_s3 = inlined_call_operand.vmem [shape: bf16[32,64], index: 3, kind: input, shape index: {}]   ;;  %s1305_s2 = inlined_call_operand.vmem [shape: f32[1,32], index: 2, kind: input, shape index: {}]   ;;  %s1306_s4 = inlined_call_operand.vmem [shape: f32[1,64], index: 4, kind: input, shape index: {}]   ;;  %s1307_s5 = inlined_call_operand.vmem [shape: f32[256,64], index: 5, kind: output, shape index: {}]  }
   0x1   :  { %v890_v0 = vld [vmem:[%s1302_s1 + $0x10] sm:$0xff]   ;;  %v891_v1 = vld [vmem:[%s1302_s1 + $0x8] sm:$0xff]   ;;  %v893_v2 = vld [vmem:[%s1303_s0] sm:$0xff]  }
   0x2   :  { %816 = vmatprep.subr.bf16.mxu0 %v890_v0  ;;  %v892_v3 = vld [vmem:[%s1302_s1] sm:$0xff]   ;;  %822 = vmatprep.mubr.msk.bf16.mxu0 %vm164_vm0, %v893_v2  ;;  %v894_v4 = vld [vmem:[%s1303_s0 + $0x8] sm:$0xff]   ;;  %v895_v5 = vld [vmem:[%s1303_s0 + $0x10] sm:$0xff]  }
   0x3   :  { %817 = vmatpush3.bf16.msra.mxu0 %v890_v0  ;;  %v896_v6 = vld [vmem:[%s1303_s0 + $0x18] sm:$0xff]   ;;  %v897_v7 = vld [vmem:[%s1303_s0 + $0x20] sm:$0xff]   ;;  %v898_v8 = vld [vmem:[%s1303_s0 + $0x28] sm:$0xff]  }
   0x4   :  { %818 = vmatprep.subr.bf16.mxu0 %v891_v1  ;;  %v899_v9 = vld [vmem:[%s1303_s0 + $0x30] sm:$0xff]   ;;  %v900_v10 = vld [vmem:[%s1303_s0 + $0x38] sm:$0xff]   ;;  %v901_v11 = vld [vmem:[%s1303_s0 + $0x40] sm:$0xff]  }
   0x5   :  { %v902_v12 = vld [vmem:[%s1303_s0 + $0x48] sm:$0xff]   ;;  %v903_v13 = vld [vmem:[%s1303_s0 + $0x50] sm:$0xff]   ;;  %v904_v14 = vld [vmem:[%s1303_s0 + $0x58] sm:$0xff]  }
   0x6   :  { %v905_v15 = vld [vmem:[%s1303_s0 + $0x60] sm:$0xff]   ;;  %v906_v16 = vld [vmem:[%s1303_s0 + $0x68] sm:$0xff]   ;;  %v907_v17 = vld [vmem:[%s1303_s0 + $0x70] sm:$0xff]  }
   0x7   :  { %819 = vmatpush3.bf16.msra.mxu0 %v891_v1  ;;  %v908_v18 = vld [vmem:[%s1303_s0 + $0x78] sm:$0xff]   ;;  %v909_v19 = vld [vmem:[%s1304_s3 + $0x8] sm:$0xff]   ;;  %v910_v20 = vld [vmem:[%s1304_s3] sm:$0xff]  }
   0x8   :  { %820 = vmatprep.subr.bf16.mxu0 %v892_v3  ;;  %854 = vmatprep.subr.bf16.mxu1 %v909_v19  ;;  %v1087_v23 = vld [vmem:[%s1305_s2] ss:$0 sm:$0xff] }
   0x9   :  { %855 = vmatpush3.bf16.msra.mxu1 %v909_v19 }
   0xa   :  { %856 = vmatprep.subr.bf16.mxu1 %v910_v20 }
   0xb   :  { %821 = vmatpush3.bf16.msra.mxu0 %v892_v3 }
   0xd   :  { %857 = vmatpush3.bf16.msra.mxu1 %v910_v20 }
   0xe   :  { %823 = vmatmul.mubr.msk.bf16.vlgmr.msra.gmra.mxu0 %vm164_vm0, %v894_v4 }
   0xf   :  { %826 = vmatprep.mubr.msk.bf16.mxu0 %vm164_vm0, %v895_v5 }
  0x16   :  { %827 = vmatmul.mubr.msk.bf16.gmra.mxu0 %vm164_vm0, %v896_v6 }
  0x17   :  { %830 = vmatprep.mubr.msk.bf16.mxu0 %vm164_vm0, %v897_v7 }
  0x1e   :  { %831 = vmatmul.mubr.msk.bf16.gmra.mxu0 %vm164_vm0, %v898_v8 }
  0x1f   :  { %834 = vmatprep.mubr.msk.bf16.mxu0 %vm164_vm0, %v899_v9 }
  0x26   :  { %835 = vmatmul.mubr.msk.bf16.gmra.mxu0 %vm164_vm0, %v900_v10 }
  0x27   :  { %838 = vmatprep.mubr.msk.bf16.mxu0 %vm164_vm0, %v901_v11 }
  0x2e   :  { %839 = vmatmul.mubr.msk.bf16.gmra.mxu0 %vm164_vm0, %v902_v12 }
  0x2f   :  { %842 = vmatprep.mubr.msk.bf16.mxu0 %vm164_vm0, %v903_v13 }
  0x36   :  { %843 = vmatmul.mubr.msk.bf16.gmra.mxu0 %vm164_vm0, %v904_v14 }
  0x37   :  { %846 = vmatprep.mubr.msk.bf16.mxu0 %vm164_vm0, %v905_v15 }
  0x3e   :  { %847 = vmatmul.mubr.msk.bf16.gmra.mxu0 %vm164_vm0, %v906_v16 }
  0x3f   :  { %850 = vmatprep.mubr.msk.bf16.mxu0 %vm164_vm0, %v907_v17 }
  0x46   :  { %851 = vmatmul.mubr.msk.bf16.gmra.mxu0 %vm164_vm0, %v908_v18 }
  0xce   :  { %v824_v21 = vpop.f32.mrf.mxu0 }
  0xcf   :  { %v256_v27 = vadd.f32 %v824_v21, %v1087_v23 }
  0xd0   :  { %v247_v22 = vpop.f32.mrf.mxu0 }
  0xd1   :  { %v248_v25 = vadd.f32 %v1087_v23, %v247_v22  ;;  %v376_v34 = vmax.f32 %v256_v27, 0.0 }
  0xd2   :  { %v825_v24 = vpop.f32.mrf.mxu0 }
  0xd3   :  { %v259_v26 = vadd.f32 %v825_v24, %v1087_v23  ;;  %v374_v32 = vmax.f32 %v248_v25, 0.0 }
  0xd4   :  { %v250_v28 = vpop.f32.mrf.mxu0 }
  0xd5   :  { %v251_v29 = vadd.f32 %v1087_v23, %v250_v28  ;;  %v377_v30 = vmax.f32 %v259_v26, 0.0 }
  0xd6   :  { %v828_v31 = vpop.f32.mrf.mxu0 }
  0xd7   :  { %v375_v33 = vmax.f32 %v251_v29, 0.0  ;;  %v407_v37 = vpack.c.bf16 %v377_v30, %v376_v34  ;;  %v272_v41 = vadd.f32 %v828_v31, %v1087_v23 }
  0xd8   :  { %v263_v35 = vpop.f32.mrf.mxu0 }
  0xd9   :  { %v406_v36 = vpack.c.bf16 %v375_v33, %v374_v32  ;;  %v264_v39 = vadd.f32 %v1087_v23, %v263_v35  ;;  %v380_v48 = vmax.f32 %v272_v41, 0.0 }
  0xda   :  { %v829_v38 = vpop.f32.mrf.mxu0 }
  0xdb   :  { %v275_v40 = vadd.f32 %v829_v38, %v1087_v23  ;;  %858 = vmatprep.mubr.msk.bf16.mxu1 %vm445_vm1, %v406_v36  ;;  %v378_v46 = vmax.f32 %v264_v39, 0.0 }
  0xdc   :  { %v266_v42 = vpop.f32.mrf.mxu0  ;;  %859 = vmatmul.mubr.msk.bf16.vlgmr.msra.gmra.mxu1 %vm445_vm1, %v407_v37 }
  0xdd   :  { %v267_v43 = vadd.f32 %v1087_v23, %v266_v42  ;;  %v381_v44 = vmax.f32 %v275_v40, 0.0 }
  0xde   :  { %v832_v45 = vpop.f32.mrf.mxu0 }
  0xdf   :  { %v379_v47 = vmax.f32 %v267_v43, 0.0  ;;  %v409_v51 = vpack.c.bf16 %v381_v44, %v380_v48  ;;  %v288_v55 = vadd.f32 %v832_v45, %v1087_v23 }
  0xe0   :  { %v279_v49 = vpop.f32.mrf.mxu0 }
  0xe1   :  { %v408_v50 = vpack.c.bf16 %v379_v47, %v378_v46  ;;  %v280_v53 = vadd.f32 %v1087_v23, %v279_v49  ;;  %v384_v62 = vmax.f32 %v288_v55, 0.0 }
  0xe2   :  { %v833_v52 = vpop.f32.mrf.mxu0 }
  0xe3   :  { %v291_v54 = vadd.f32 %v833_v52, %v1087_v23  ;;  %862 = vmatprep.mubr.msk.bf16.mxu1 %vm445_vm1, %v408_v50  ;;  %v382_v60 = vmax.f32 %v280_v53, 0.0 }
  0xe4   :  { %v282_v56 = vpop.f32.mrf.mxu0  ;;  %863 = vmatmul.mubr.msk.bf16.gmra.mxu1 %vm445_vm1, %v409_v51 }
  0xe5   :  { %v283_v57 = vadd.f32 %v1087_v23, %v282_v56  ;;  %v385_v58 = vmax.f32 %v291_v54, 0.0 }
  0xe6   :  { %v836_v59 = vpop.f32.mrf.mxu0 }
  0xe7   :  { %v383_v61 = vmax.f32 %v283_v57, 0.0  ;;  %v411_v1 = vpack.c.bf16 %v385_v58, %v384_v62  ;;  %v304_v5 = vadd.f32 %v836_v59, %v1087_v23 }
  0xe8   :  { %v295_v63 = vpop.f32.mrf.mxu0 }
  0xe9   :  { %v410_v0 = vpack.c.bf16 %v383_v61, %v382_v60  ;;  %v296_v3 = vadd.f32 %v1087_v23, %v295_v63  ;;  %v388_v12 = vmax.f32 %v304_v5, 0.0 }
  0xea   :  { %v837_v2 = vpop.f32.mrf.mxu0 }
  0xeb   :  { %v307_v4 = vadd.f32 %v837_v2, %v1087_v23  ;;  %866 = vmatprep.mubr.msk.bf16.mxu1 %vm445_vm1, %v410_v0  ;;  %v386_v10 = vmax.f32 %v296_v3, 0.0 }
  0xec   :  { %v298_v6 = vpop.f32.mrf.mxu0  ;;  %867 = vmatmul.mubr.msk.bf16.gmra.mxu1 %vm445_vm1, %v411_v1 }
  0xed   :  { %v299_v7 = vadd.f32 %v1087_v23, %v298_v6  ;;  %v389_v8 = vmax.f32 %v307_v4, 0.0 }
  0xee   :  { %v840_v9 = vpop.f32.mrf.mxu0 }
  0xef   :  { %v387_v11 = vmax.f32 %v299_v7, 0.0  ;;  %v413_v15 = vpack.c.bf16 %v389_v8, %v388_v12  ;;  %v320_v19 = vadd.f32 %v840_v9, %v1087_v23  ;;  %v1140_v7 = vld [vmem:[%s1306_s4] ss:$0 sm:$0xff] }
  0xf0   :  { %v311_v13 = vpop.f32.mrf.mxu0 }
  0xf1   :  { %v412_v14 = vpack.c.bf16 %v387_v11, %v386_v10  ;;  %v312_v17 = vadd.f32 %v1087_v23, %v311_v13  ;;  %v392_v27 = vmax.f32 %v320_v19, 0.0 }
  0xf2   :  { %v841_v16 = vpop.f32.mrf.mxu0 }
  0xf3   :  { %v323_v18 = vadd.f32 %v841_v16, %v1087_v23  ;;  %870 = vmatprep.mubr.msk.bf16.mxu1 %vm445_vm1, %v412_v14  ;;  %v390_v25 = vmax.f32 %v312_v17, 0.0 }
  0xf4   :  { %v314_v20 = vpop.f32.mrf.mxu0  ;;  %871 = vmatmul.mubr.msk.bf16.gmra.mxu1 %vm445_vm1, %v413_v15 }
  0xf5   :  { %v315_v21 = vadd.f32 %v1087_v23, %v314_v20  ;;  %v393_v22 = vmax.f32 %v323_v18, 0.0 }
  0xf6   :  { %v844_v24 = vpop.f32.mrf.mxu0 }
  0xf7   :  { %v391_v26 = vmax.f32 %v315_v21, 0.0  ;;  %v415_v30 = vpack.c.bf16 %v393_v22, %v392_v27  ;;  %v336_v34 = vadd.f32 %v844_v24, %v1087_v23 }
  0xf8   :  { %v327_v28 = vpop.f32.mrf.mxu0 }
  0xf9   :  { %v414_v29 = vpack.c.bf16 %v391_v26, %v390_v25  ;;  %v328_v32 = vadd.f32 %v1087_v23, %v327_v28  ;;  %v396_v41 = vmax.f32 %v336_v34, 0.0 }
  0xfa   :  { %v845_v31 = vpop.f32.mrf.mxu0 }
  0xfb   :  { %v339_v33 = vadd.f32 %v845_v31, %v1087_v23  ;;  %874 = vmatprep.mubr.msk.bf16.mxu1 %vm445_vm1, %v414_v29  ;;  %v394_v39 = vmax.f32 %v328_v32, 0.0 }
  0xfc   :  { %v330_v35 = vpop.f32.mrf.mxu0  ;;  %875 = vmatmul.mubr.msk.bf16.gmra.mxu1 %vm445_vm1, %v415_v30 }
  0xfd   :  { %v331_v36 = vadd.f32 %v1087_v23, %v330_v35  ;;  %v397_v37 = vmax.f32 %v339_v33, 0.0 }
  0xfe   :  { %v848_v38 = vpop.f32.mrf.mxu0 }
  0xff   :  { %v395_v40 = vmax.f32 %v331_v36, 0.0  ;;  %v417_v44 = vpack.c.bf16 %v397_v37, %v396_v41  ;;  %v352_v48 = vadd.f32 %v848_v38, %v1087_v23 }
 0x100   :  { %v343_v42 = vpop.f32.mrf.mxu0 }
 0x101   :  { %v416_v43 = vpack.c.bf16 %v395_v40, %v394_v39  ;;  %v344_v46 = vadd.f32 %v1087_v23, %v343_v42  ;;  %v400_v55 = vmax.f32 %v352_v48, 0.0 }
 0x102   :  { %v849_v45 = vpop.f32.mrf.mxu0 }
 0x103   :  { %v355_v47 = vadd.f32 %v849_v45, %v1087_v23  ;;  %878 = vmatprep.mubr.msk.bf16.mxu1 %vm445_vm1, %v416_v43  ;;  %v398_v53 = vmax.f32 %v344_v46, 0.0 }
 0x104   :  { %v346_v49 = vpop.f32.mrf.mxu0  ;;  %879 = vmatmul.mubr.msk.bf16.gmra.mxu1 %vm445_vm1, %v417_v44 }
 0x105   :  { %v347_v50 = vadd.f32 %v1087_v23, %v346_v49  ;;  %v401_v51 = vmax.f32 %v355_v47, 0.0 }
 0x106   :  { %v852_v52 = vpop.f32.mrf.mxu0 }
 0x107   :  { %v399_v54 = vmax.f32 %v347_v50, 0.0  ;;  %v419_v58 = vpack.c.bf16 %v401_v51, %v400_v55  ;;  %v368_v62 = vadd.f32 %v852_v52, %v1087_v23 }
 0x108   :  { %v359_v56 = vpop.f32.mrf.mxu0 }
 0x109   :  { %v418_v57 = vpack.c.bf16 %v399_v54, %v398_v53  ;;  %v360_v60 = vadd.f32 %v1087_v23, %v359_v56  ;;  %v404_v4 = vmax.f32 %v368_v62, 0.0 }
 0x10a   :  { %v853_v59 = vpop.f32.mrf.mxu0 }
 0x10b   :  { %v371_v61 = vadd.f32 %v853_v59, %v1087_v23  ;;  %882 = vmatprep.mubr.msk.bf16.mxu1 %vm445_vm1, %v418_v57  ;;  %v402_v2 = vmax.f32 %v360_v60, 0.0 }
 0x10c   :  { %v362_v63 = vpop.f32.mrf.mxu0  ;;  %883 = vmatmul.mubr.msk.bf16.gmra.mxu1 %vm445_vm1, %v419_v58 }
 0x10d   :  { %v363_v0 = vadd.f32 %v1087_v23, %v362_v63  ;;  %v405_v1 = vmax.f32 %v371_v61, 0.0 }
 0x10f   :  { %v403_v3 = vmax.f32 %v363_v0, 0.0  ;;  %v421_v6 = vpack.c.bf16 %v405_v1, %v404_v4 }
 0x111   :  { %v420_v5 = vpack.c.bf16 %v403_v3, %v402_v2 }
 0x113   :  { %886 = vmatprep.mubr.msk.bf16.mxu1 %vm445_vm1, %v420_v5 }
 0x114   :  { %887 = vmatmul.mubr.msk.bf16.gmra.mxu1 %vm445_vm1, %v421_v6 }
 0x19c   :  { %v860_v8 = vpop.f32.mrf.mxu1 }
 0x19d   :  { %v537_v9 = vadd.f32 %v860_v8, %v1140_v7 }
 0x19e   :  { %v528_v10 = vpop.f32.mrf.mxu1 }
 0x19f   :  { %911 = vtanh.f32 %v537_v9  ;;  %v529_v23 = vadd.f32 %v1140_v7, %v528_v10 }
 0x1a0   :  { %v861_v11 = vpop.f32.mrf.mxu1 }
 0x1a1   :  { %913 = vtanh.f32 %v529_v23  ;;  %v540_v12 = vadd.f32 %v861_v11, %v1140_v7 }
 0x1a2   :  { %v531_v13 = vpop.f32.mrf.mxu1 }
 0x1a3   :  { %915 = vtanh.f32 %v540_v12  ;;  %v532_v14 = vadd.f32 %v1140_v7, %v531_v13 }
 0x1a4   :  { %v864_v15 = vpop.f32.mrf.mxu1 }
 0x1a5   :  { %917 = vtanh.f32 %v532_v14  ;;  %v553_v16 = vadd.f32 %v864_v15, %v1140_v7 }
 0x1a6   :  { %v544_v17 = vpop.f32.mrf.mxu1 }
 0x1a7   :  { %919 = vtanh.f32 %v553_v16  ;;  %v545_v18 = vadd.f32 %v1140_v7, %v544_v17 }
 0x1a8   :  { %v865_v19 = vpop.f32.mrf.mxu1 }
 0x1a9   :  { %921 = vtanh.f32 %v545_v18  ;;  %v556_v20 = vadd.f32 %v865_v19, %v1140_v7 }
 0x1aa   :  { %v547_v21 = vpop.f32.mrf.mxu1 }
 0x1ab   :  { %923 = vtanh.f32 %v556_v20  ;;  %v548_v22 = vadd.f32 %v1140_v7, %v547_v21 }
 0x1ac   :  { %v912_v24 = vpop.eup %911  ;;  %v868_v25 = vpop.f32.mrf.mxu1 }
 0x1ad   :  { %690 = vst.msk [vmem:[%s1307_s5 + $0x10] sm:$0xff] %vm687_vm2, %v912_v24  ;;  %925 = vtanh.f32 %v548_v22  ;;  %v569_v26 = vadd.f32 %v868_v25, %v1140_v7 }
 0x1ae   :  { %v914_v27 = vpop.eup %913  ;;  %v560_v28 = vpop.f32.mrf.mxu1 }
 0x1af   :  { %688 = vst.msk [vmem:[%s1307_s5] sm:$0xff] %vm687_vm2, %v914_v27  ;;  %927 = vtanh.f32 %v569_v26  ;;  %v561_v29 = vadd.f32 %v1140_v7, %v560_v28 }
 0x1b0   :  { %v916_v30 = vpop.eup %915  ;;  %v869_v31 = vpop.f32.mrf.mxu1 }
 0x1b1   :  { %691 = vst.msk [vmem:[%s1307_s5 + $0x18] sm:$0xff] %vm687_vm2, %v916_v30  ;;  %929 = vtanh.f32 %v561_v29  ;;  %v572_v32 = vadd.f32 %v869_v31, %v1140_v7 }
 0x1b2   :  { %v918_v33 = vpop.eup %917  ;;  %v563_v34 = vpop.f32.mrf.mxu1 }
 0x1b3   :  { %689 = vst.msk [vmem:[%s1307_s5 + $0x8] sm:$0xff] %vm687_vm2, %v918_v33  ;;  %931 = vtanh.f32 %v572_v32  ;;  %v564_v35 = vadd.f32 %v1140_v7, %v563_v34 }
 0x1b4   :  { %v920_v36 = vpop.eup %919  ;;  %v872_v37 = vpop.f32.mrf.mxu1 }
 0x1b5   :  { %694 = vst.msk [vmem:[%s1307_s5 + $0x30] sm:$0xff] %vm687_vm2, %v920_v36  ;;  %933 = vtanh.f32 %v564_v35  ;;  %v585_v38 = vadd.f32 %v872_v37, %v1140_v7 }
 0x1b6   :  { %v922_v39 = vpop.eup %921  ;;  %v576_v40 = vpop.f32.mrf.mxu1 }
 0x1b7   :  { %692 = vst.msk [vmem:[%s1307_s5 + $0x20] sm:$0xff] %vm687_vm2, %v922_v39  ;;  %935 = vtanh.f32 %v585_v38  ;;  %v577_v41 = vadd.f32 %v1140_v7, %v576_v40 }
 0x1b8   :  { %v924_v42 = vpop.eup %923  ;;  %v873_v43 = vpop.f32.mrf.mxu1 }
 0x1b9   :  { %695 = vst.msk [vmem:[%s1307_s5 + $0x38] sm:$0xff] %vm687_vm2, %v924_v42  ;;  %937 = vtanh.f32 %v577_v41  ;;  %v588_v44 = vadd.f32 %v873_v43, %v1140_v7 }
 0x1ba   :  { %v926_v45 = vpop.eup %925  ;;  %v579_v46 = vpop.f32.mrf.mxu1 }
 0x1bb   :  { %693 = vst.msk [vmem:[%s1307_s5 + $0x28] sm:$0xff] %vm687_vm2, %v926_v45  ;;  %939 = vtanh.f32 %v588_v44  ;;  %v580_v47 = vadd.f32 %v1140_v7, %v579_v46 }
 0x1bc   :  { %v928_v48 = vpop.eup %927  ;;  %v876_v49 = vpop.f32.mrf.mxu1 }
 0x1bd   :  { %698 = vst.msk [vmem:[%s1307_s5 + $0x50] sm:$0xff] %vm687_vm2, %v928_v48  ;;  %941 = vtanh.f32 %v580_v47  ;;  %v601_v50 = vadd.f32 %v876_v49, %v1140_v7 }
 0x1be   :  { %v930_v51 = vpop.eup %929  ;;  %v592_v52 = vpop.f32.mrf.mxu1 }
 0x1bf   :  { %696 = vst.msk [vmem:[%s1307_s5 + $0x40] sm:$0xff] %vm687_vm2, %v930_v51  ;;  %943 = vtanh.f32 %v601_v50  ;;  %v593_v53 = vadd.f32 %v1140_v7, %v592_v52 }
 0x1c0   :  { %v932_v54 = vpop.eup %931  ;;  %v877_v55 = vpop.f32.mrf.mxu1 }
 0x1c1   :  { %699 = vst.msk [vmem:[%s1307_s5 + $0x58] sm:$0xff] %vm687_vm2, %v932_v54  ;;  %945 = vtanh.f32 %v593_v53  ;;  %v604_v56 = vadd.f32 %v877_v55, %v1140_v7 }
 0x1c2   :  { %v934_v57 = vpop.eup %933  ;;  %v595_v58 = vpop.f32.mrf.mxu1 }
 0x1c3   :  { %697 = vst.msk [vmem:[%s1307_s5 + $0x48] sm:$0xff] %vm687_vm2, %v934_v57  ;;  %947 = vtanh.f32 %v604_v56  ;;  %v596_v59 = vadd.f32 %v1140_v7, %v595_v58 }
 0x1c4   :  { %v936_v60 = vpop.eup %935  ;;  %v880_v61 = vpop.f32.mrf.mxu1 }
 0x1c5   :  { %702 = vst.msk [vmem:[%s1307_s5 + $0x70] sm:$0xff] %vm687_vm2, %v936_v60  ;;  %949 = vtanh.f32 %v596_v59  ;;  %v617_v62 = vadd.f32 %v880_v61, %v1140_v7 }
 0x1c6   :  { %v938_v63 = vpop.eup %937  ;;  %v608_v0 = vpop.f32.mrf.mxu1 }
 0x1c7   :  { %700 = vst.msk [vmem:[%s1307_s5 + $0x60] sm:$0xff] %vm687_vm2, %v938_v63  ;;  %951 = vtanh.f32 %v617_v62  ;;  %v609_v1 = vadd.f32 %v1140_v7, %v608_v0 }
 0x1c8   :  { %v940_v2 = vpop.eup %939  ;;  %v881_v3 = vpop.f32.mrf.mxu1 }
 0x1c9   :  { %703 = vst.msk [vmem:[%s1307_s5 + $0x78] sm:$0xff] %vm687_vm2, %v940_v2  ;;  %953 = vtanh.f32 %v609_v1  ;;  %v620_v4 = vadd.f32 %v881_v3, %v1140_v7 }
 0x1ca   :  { %v942_v5 = vpop.eup %941  ;;  %v611_v6 = vpop.f32.mrf.mxu1 }
 0x1cb   :  { %701 = vst.msk [vmem:[%s1307_s5 + $0x68] sm:$0xff] %vm687_vm2, %v942_v5  ;;  %955 = vtanh.f32 %v620_v4  ;;  %v612_v8 = vadd.f32 %v1140_v7, %v611_v6 }
 0x1cc   :  { %v944_v9 = vpop.eup %943  ;;  %v884_v10 = vpop.f32.mrf.mxu1 }
 0x1cd   :  { %706 = vst.msk [vmem:[%s1307_s5 + $0x90] sm:$0xff] %vm687_vm2, %v944_v9  ;;  %957 = vtanh.f32 %v612_v8  ;;  %v633_v23 = vadd.f32 %v884_v10, %v1140_v7 }
 0x1ce   :  { %v946_v11 = vpop.eup %945  ;;  %v624_v12 = vpop.f32.mrf.mxu1 }
 0x1cf   :  { %704 = vst.msk [vmem:[%s1307_s5 + $0x80] sm:$0xff] %vm687_vm2, %v946_v11  ;;  %959 = vtanh.f32 %v633_v23  ;;  %v625_v13 = vadd.f32 %v1140_v7, %v624_v12 }
 0x1d0   :  { %v948_v14 = vpop.eup %947  ;;  %v885_v15 = vpop.f32.mrf.mxu1 }
 0x1d1   :  { %707 = vst.msk [vmem:[%s1307_s5 + $0x98] sm:$0xff] %vm687_vm2, %v948_v14  ;;  %961 = vtanh.f32 %v625_v13  ;;  %v636_v16 = vadd.f32 %v885_v15, %v1140_v7 }
 0x1d2   :  { %v950_v17 = vpop.eup %949  ;;  %v627_v18 = vpop.f32.mrf.mxu1 }
 0x1d3   :  { %705 = vst.msk [vmem:[%s1307_s5 + $0x88] sm:$0xff] %vm687_vm2, %v950_v17  ;;  %963 = vtanh.f32 %v636_v16  ;;  %v628_v19 = vadd.f32 %v1140_v7, %v627_v18 }
 0x1d4   :  { %v952_v20 = vpop.eup %951  ;;  %v888_v21 = vpop.f32.mrf.mxu1 }
 0x1d5   :  { %710 = vst.msk [vmem:[%s1307_s5 + $0xb0] sm:$0xff] %vm687_vm2, %v952_v20  ;;  %965 = vtanh.f32 %v628_v19  ;;  %v649_v22 = vadd.f32 %v888_v21, %v1140_v7 }
 0x1d6   :  { %v954_v24 = vpop.eup %953  ;;  %v640_v25 = vpop.f32.mrf.mxu1 }
 0x1d7   :  { %708 = vst.msk [vmem:[%s1307_s5 + $0xa0] sm:$0xff] %vm687_vm2, %v954_v24  ;;  %967 = vtanh.f32 %v649_v22  ;;  %v641_v26 = vadd.f32 %v1140_v7, %v640_v25 }
 0x1d8   :  { %v956_v27 = vpop.eup %955  ;;  %v889_v28 = vpop.f32.mrf.mxu1 }
 0x1d9   :  { %711 = vst.msk [vmem:[%s1307_s5 + $0xb8] sm:$0xff] %vm687_vm2, %v956_v27  ;;  %969 = vtanh.f32 %v641_v26  ;;  %v652_v29 = vadd.f32 %v889_v28, %v1140_v7 }
 0x1da   :  { %v958_v30 = vpop.eup %957  ;;  %v643_v31 = vpop.f32.mrf.mxu1 }
 0x1db   :  { %709 = vst.msk [vmem:[%s1307_s5 + $0xa8] sm:$0xff] %vm687_vm2, %v958_v30  ;;  %971 = vtanh.f32 %v652_v29  ;;  %v644_v32 = vadd.f32 %v1140_v7, %v643_v31 }
 0x1dc   :  { %v960_v33 = vpop.eup %959 }
 0x1dd   :  { %714 = vst.msk [vmem:[%s1307_s5 + $0xd0] sm:$0xff] %vm687_vm2, %v960_v33  ;;  %973 = vtanh.f32 %v644_v32 }
 0x1de   :  { %v962_v34 = vpop.eup %961 }
 0x1df   :  { %712 = vst.msk [vmem:[%s1307_s5 + $0xc0] sm:$0xff] %vm687_vm2, %v962_v34 }
 0x1e0   :  { %v964_v35 = vpop.eup %963 }
 0x1e1   :  { %715 = vst.msk [vmem:[%s1307_s5 + $0xd8] sm:$0xff] %vm687_vm2, %v964_v35 }
 0x1e2   :  { %v966_v7 = vpop.eup %965 }
 0x1e3   :  { %713 = vst.msk [vmem:[%s1307_s5 + $0xc8] sm:$0xff] %vm687_vm2, %v966_v7 }
 0x1e4   :  { %v968_v36 = vpop.eup %967 }
 0x1e5   :  { %718 = vst.msk [vmem:[%s1307_s5 + $0xf0] sm:$0xff] %vm687_vm2, %v968_v36 }
 0x1e6   :  { %v970_v37 = vpop.eup %969 }
 0x1e7   :  { %716 = vst.msk [vmem:[%s1307_s5 + $0xe0] sm:$0xff] %vm687_vm2, %v970_v37 }
 0x1e8   :  { %v972_v38 = vpop.eup %971 }
 0x1e9   :  { %719 = vst.msk [vmem:[%s1307_s5 + $0xf8] sm:$0xff] %vm687_vm2, %v972_v38 }
 0x1ea   :  { %v974_v39 = vpop.eup %973 }
 0x1eb   :  { %717 = vst.msk [vmem:[%s1307_s5 + $0xe8] sm:$0xff] %vm687_vm2, %v974_v39 }

</bundles_post_ra>
